<compile_context>
chip_gen: v6e
topology: v6e:2x2x1
jax: 0.10.0
libtpu: 0.0.40
codegen_flags: <defaults>
</compile_context>

<pallas_src>
import functools

import jax
import jax.numpy as jnp
from jax import lax
from jax.experimental import pallas as pl
from jax.experimental.pallas import tpu as pltpu


def _linear_kernel(x_ref, wt_ref, b_ref, o_ref):
    # x_ref: (TB, D_in)  wt_ref: (D_in, D_out)  b_ref: (1, D_out)  o_ref: (TB, D_out)
    o_ref[...] = (
        jnp.dot(
            x_ref[...],
            wt_ref[...],
            preferred_element_type=jnp.float32,
            precision=lax.Precision.HIGHEST,
        )
        + b_ref[...]
    )


def prepare_params(w, b):
    """One-time parameter layout prep (hoisted out of the forward path).

    w: (D_out, D_in) -> w_t: (D_in, D_out) float32
    b: (D_out,)      -> b2d: (1, D_out)    float32
    """
    w_t = jnp.asarray(w, jnp.float32).T
    b2d = jnp.asarray(b, jnp.float32).reshape(1, -1)
    # Materialize once so the transpose is not re-executed per forward call.
    return jax.block_until_ready(w_t), jax.block_until_ready(b2d)


def _round_up(x, m):
    return ((x + m - 1) // m) * m


@functools.partial(jax.jit, static_argnames=("row_tile",))
def linear_regressor_basic(x, w_t, b2d, *, row_tile=4096):
    """y = x @ w.T + b, given pre-transposed w_t (D_in, D_out) and b2d (1, D_out).

    x is expected to be float32 of shape (B, D_in); returns (B, D_out) float32.
    """
    B, D_in = x.shape
    D_out = w_t.shape[1]

    def cost(rows):
        return pl.CostEstimate(
            flops=2 * rows * D_in * D_out,
            transcendentals=0,
            bytes_accessed=4 * (rows * D_in + D_in * D_out + D_out + rows * D_out),
        )

    if B <= row_tile:
        # Launch-latency-bound small case: single block, no grid, no pipelining;
        # whole arrays resident in VMEM. The pallas_call is the only dispatch in
        # this traced function.
        return pl.pallas_call(
            _linear_kernel,
            out_shape=jax.ShapeDtypeStruct((B, D_out), jnp.float32),
            in_specs=[
                pl.BlockSpec(memory_space=pltpu.MemorySpace.VMEM),
                pl.BlockSpec(memory_space=pltpu.MemorySpace.VMEM),
                pl.BlockSpec(memory_space=pltpu.MemorySpace.VMEM),
            ],
            out_specs=pl.BlockSpec(memory_space=pltpu.MemorySpace.VMEM),
            cost_estimate=cost(B),
        )(x, w_t, b2d)

    # HBM-bound large-batch path: tile over batch rows only; reduction (D_in) and
    # output (D_out) stay whole. Ensure at least 2 grid steps so the "parallel"
    # axis can split across v7x's two TensorCores. Ragged last block is handled
    # by Pallas edge masking (no jnp.pad of x, no output slice).
    tile = min(row_tile, _round_up(pl.cdiv(B, 2), 8))
    grid = (pl.cdiv(B, tile),)
    return pl.pallas_call(
        _linear_kernel,
        out_shape=jax.ShapeDtypeStruct((B, D_out), jnp.float32),
        grid=grid,
        in_specs=[
            pl.BlockSpec((tile, D_in), lambda i: (i, 0)),
            pl.BlockSpec((D_in, D_out), lambda i: (0, 0)),
            pl.BlockSpec((1, D_out), lambda i: (0, 0)),
        ],
        out_specs=pl.BlockSpec((tile, D_out), lambda i: (i, 0)),
        compiler_params=pltpu.CompilerParams(
            dimension_semantics=("parallel",),
        ),
        cost_estimate=cost(B),
    )(x, w_t, b2d)


if __name__ == "__main__":
    # Small shapes consistent with the module: input_dim=32, output_dim=16, batch=8.
    batch, input_dim, output_dim = 8, 32, 16

    key = jax.random.PRNGKey(0)
    kx, kw, kx2 = jax.random.split(key, 3)

    x = jax.random.normal(kx, (batch, input_dim), dtype=jnp.float32)
    w = jax.random.normal(kw, (output_dim, input_dim), dtype=jnp.float32)
    b = jnp.zeros((output_dim,), dtype=jnp.float32)

    # One-time parameter prep (hoisted out of the forward path).
    w_t, b2d = prepare_params(w, b)

    # Small (single-block) path.
    y = linear_regressor_basic(x, w_t, b2d)
    jax.block_until_ready(y)

    y_ref = jnp.dot(x, w.T, precision=lax.Precision.HIGHEST) + b
    assert y.shape == (batch, output_dim)
    assert jnp.allclose(y, y_ref, atol=1e-5, rtol=1e-5)

    # Also exercise the batch-tiled (grid) path, including a ragged last block,
    # at a still-modest size (row_tile forced small so B > row_tile).
    big_batch = 1000
    x_big = jax.random.normal(kx2, (big_batch, input_dim), dtype=jnp.float32)
    y_big = linear_regressor_basic(x_big, w_t, b2d, row_tile=256)
    jax.block_until_ready(y_big)
    y_big_ref = jnp.dot(x_big, w.T, precision=lax.Precision.HIGHEST) + b
    assert y_big.shape == (big_batch, output_dim)
    assert jnp.allclose(y_big, y_big_ref, atol=1e-4, rtol=1e-4)

    print("KERNEL_OK")
</pallas_src>

<mosaic_0001>
module attributes {stable_mosaic.version = 11 : i64} {
  func.func @_linear_kernel(%arg0: memref<8x32xf32, #tpu.memory_space<vmem>>, %arg1: memref<32x16xf32, #tpu.memory_space<vmem>>, %arg2: memref<1x16xf32, #tpu.memory_space<vmem>>, %arg3: memref<8x16xf32, #tpu.memory_space<vmem>>) attributes {dimension_semantics = [], scalar_prefetch = 0 : i64, scratch_operands = 0 : i64, tpu.core_type = #tpu.core_type<tc>} {
    %c0 = arith.constant 0 : index
    %c0_0 = arith.constant 0 : index
    %0 = vector.load %arg0[%c0, %c0_0] : memref<8x32xf32, #tpu.memory_space<vmem>>, vector<8x32xf32>
    %c0_1 = arith.constant 0 : index
    %c0_2 = arith.constant 0 : index
    %1 = vector.load %arg1[%c0_1, %c0_2] : memref<32x16xf32, #tpu.memory_space<vmem>>, vector<32x16xf32>
    %cst = arith.constant dense<0.000000e+00> : vector<8x16xf32>
    %2 = tpu.matmul %0, %1, %cst {dimension_numbers = #tpu.dot_dimension_numbers<[1], [0], [0], [1], [0, 0, 1, 1], [], []>, precision = #tpu.contract_precision<fp32>} : vector<8x32xf32>, vector<32x16xf32>, vector<8x16xf32> -> vector<8x16xf32>
    %c0_3 = arith.constant 0 : index
    %c0_4 = arith.constant 0 : index
    %3 = vector.load %arg2[%c0_3, %c0_4] : memref<1x16xf32, #tpu.memory_space<vmem>>, vector<1x16xf32>
    %4 = vector.broadcast %3 : vector<1x16xf32> to vector<8x16xf32>
    %5 = arith.addf %2, %4 : vector<8x16xf32>
    %c0_5 = arith.constant 0 : index
    %c0_6 = arith.constant 0 : index
    %6 = vector.load %arg3[%c0_5, %c0_6] : memref<8x16xf32, #tpu.memory_space<vmem>>, vector<8x16xf32>
    tpu.vector_store %arg3[%c0_5, %c0_6], %5 {strides = array<i32>} : memref<8x16xf32, #tpu.memory_space<vmem>>, vector<8x16xf32>,
    return
  }
}

</mosaic_0001>

<bundles_post_ra>
// kernel: linear_regressor_basic.1
= control target key start
LH: loop header
LB: loop body
LE: loop exit
PB: predicated region body
PF: predicated region fallthrough
CT: control target
= control target key end

     0   :  { %vm27_vm0 = vcmask 261120   ;;  %v654_v3 = vmov 0.0   ;;  %vm655_vm1 = vmmov 0   ;;  %s764_s0 = inlined_call_operand.vmem [shape: f32[8,32], index: 0, kind: input, shape index: {}]   ;;  %s765_s1 = inlined_call_operand.vmem [shape: f32[32,16], index: 1, kind: input, shape index: {}]   ;;  %s766_s2 = inlined_call_operand.vmem [shape: f32[1,16], index: 2, kind: input, shape index: {}]   ;;  %s767_s3 = inlined_call_operand.hbm [shape: f32[8,16], index: 3, kind: output, shape index: {}]  }
   0x1   :  { %v19_v0 = vld [vmem:[%s765_s1 + $0x18] sm:$0xff]  ;;  %v18_v1 = vld [vmem:[%s765_s1 + $0x10] sm:$0xff]  ;;  %v17_v2 = vld [vmem:[%s765_s1 + $0x8] sm:$0xff]  ;;  %563 = vmatprep.subr.mxu0 %v654_v3  ;;  %574 = vmatprep.subr.mxu1 %v654_v3 }
   0x2   :  { %v687_v4 = vand.u32 4294901760, %v19_v0  ;;  %v689_v5 = vand.u32 4294901760, %v18_v1  ;;  %v691_v6 = vand.u32 4294901760, %v17_v2  ;;  %v16_v7 = vld [vmem:[%s765_s1] sm:$0xff]  ;;  %571 = vmatprep.mubr.msk.f32.mxu0 %vm655_vm1, %v654_v3  ;;  %582 = vmatprep.mubr.msk.f32.mxu1 %vm655_vm1, %v654_v3 }
   0x3   :  { %v15_v8 = vld [vmem:[%s764_s0] sm:$0xff]  ;;  %v700_v9 = vand.u32 4294901760, %v16_v7 }
   0x4   :  { %v29_v10 = vsel %vm27_vm0, %v15_v8, 0 }
   0x5   :  { %8 = vsyncpa [#allocation3], 0  ;;  %564 = vmatpush3.msra.mxu0 %v687_v4  ;;  %v136_v11 = vsub.f32 %v19_v0, %v687_v4  ;;  %v708_v12 = vand.u32 4294901760, %v29_v10  ;;  %v143_v13 = vsub.f32 %v18_v1, %v689_v5  ;;  %v150_v14 = vsub.f32 %v17_v2, %v691_v6  ;;  %v532_v35 = vld [vmem:[%s766_s2] ss:$0 sm:$0xff]  ;;  %s656_s22 = smov [#allocation2]  }
   0x6   :  { %565 = vmatprep.subr.mxu0 %v654_v3  ;;  %v157_v15 = vsub.f32 %v16_v7, %v700_v9  ;;  %s524_s23 = sshll.u32 %s656_s22, 4  ;;  %vm516_vm2 = vcmask 130048   ;;  %s525_s23 = int_to_ptr.vmem [resolvable:$true] %s524_s23 }
   0x7   :  { %566 = vmatpush3.msra.mxu0 %v689_v5  ;;  %v137_v16 = vand.u32 4294901760, %v136_v11  ;;  %v101_v17 = vsub.f32 %v29_v10, %v708_v12  ;;  %v144_v18 = vand.u32 4294901760, %v143_v13  ;;  %v151_v19 = vand.u32 4294901760, %v150_v14  ;;  %s632_s2 = scalar_lea.vmem %s525_s23, 128  ;;  %p637_p1 = scmp.lt.s32.totalorder %s525_s23, %s525_s23 }
   0x8   :  { %567 = vmatprep.subr.mxu0 %v654_v3  ;;  %v158_v20 = vand.u32 4294901760, %v157_v15  ;;  %p633_p0 = scmp.ne.s32.totalorder %s525_s23, %s632_s2  ;;  %p638_p2 = scmp.lt.s32.totalorder %s632_s2, %s632_s2 }
   0x9   :  { %568 = vmatpush3.msra.mxu0 %v691_v6  ;;  %v138_v21 = vsub.f32 %v136_v11, %v137_v16  ;;  %v102_v22 = vand.u32 4294901760, %v101_v17  ;;  %v145_v23 = vsub.f32 %v143_v13, %v144_v18  ;;  %v152_v24 = vsub.f32 %v150_v14, %v151_v19 }
   0xa   :  { %569 = vmatprep.subr.mxu0 %v654_v3  ;;  %v159_v28 = vsub.f32 %v157_v15, %v158_v20  ;;  %p639_p3 = por %p638_p2, %p637_p1 }
   0xb   :  { %570 = vmatpush3.msra.mxu0 %v700_v9  ;;  %v139_v25 = vand.u32 4294901760, %v138_v21  ;;  %v103_v26 = vsub.f32 %v101_v17, %v102_v22  ;;  %v146_v27 = vand.u32 4294901760, %v145_v23  ;;  %v153_v30 = vand.u32 4294901760, %v152_v24 }
   0xc   :  { %585 = vmatprep.subr.mxu0 %v654_v3  ;;  %v160_v31 = vand.u32 4294901760, %v159_v28  ;;  %p640_p4 = pnand %p639_p3, %p633_p0 }
   0xd   :  { %575 = vmatpush3.msra.mxu1 %v139_v25  ;;  %v104_v29 = vand.u32 4294901760, %v103_v26 }
   0xe   :  { %576 = vmatprep.subr.mxu1 %v654_v3 }
   0xf   :  { %572 = vmatmul.mubr.f32.vlgmr.msra.gmra.mxu0 %v104_v29  ;;  %577 = vmatpush3.msra.mxu1 %v146_v27 }
  0x10   :  { %586 = vmatpush3.msra.mxu0 %v136_v11  ;;  %578 = vmatprep.subr.mxu1 %v654_v3 }
  0x11   :  { %587 = vmatprep.subr.mxu0 %v654_v3  ;;  %579 = vmatpush3.msra.mxu1 %v153_v30 }
  0x12   :  { %588 = vmatpush3.msra.mxu0 %v143_v13  ;;  %580 = vmatprep.subr.mxu1 %v654_v3 }
  0x13   :  { %589 = vmatprep.subr.mxu0 %v654_v3  ;;  %581 = vmatpush3.msra.mxu1 %v160_v31 }
  0x14   :  { %590 = vmatpush3.msra.mxu0 %v150_v14  ;;  %583 = vmatmul.mubr.f32.vlgmr.msra.gmra.mxu1 %v708_v12 }
  0x15   :  { %591 = vmatprep.subr.mxu0 %v654_v3  ;;  %596 = vmatprep.subr.mxu1 %v654_v3 }
  0x16   :  { %592 = vmatpush3.msra.mxu0 %v157_v15  ;;  %597 = vmatpush3.msra.mxu1 %v687_v4 }
  0x17   :  { %593 = vmatprep.mubr.msk.f32.mxu0 %vm655_vm1, %v654_v3  ;;  %598 = vmatprep.subr.mxu1 %v654_v3 }
  0x18   :  { %607 = vmatprep.subr.mxu0 %v654_v3  ;;  %594 = vmatmul.mubr.f32.vlgmr.msra.gmra.mxu0 %v101_v17 }
  0x19   :  { %599 = vmatpush3.msra.mxu1 %v689_v5  ;;  %608 = vmatpush3.msra.mxu0 %v137_v16 }
  0x1a   :  { %600 = vmatprep.subr.mxu1 %v654_v3  ;;  %609 = vmatprep.subr.mxu0 %v654_v3 }
  0x1b   :  { %601 = vmatpush3.msra.mxu1 %v691_v6  ;;  %610 = vmatpush3.msra.mxu0 %v144_v18 }
  0x1c   :  { %602 = vmatprep.subr.mxu1 %v654_v3  ;;  %611 = vmatprep.subr.mxu0 %v654_v3 }
  0x1d   :  { %603 = vmatpush3.msra.mxu1 %v700_v9  ;;  %604 = vmatprep.mubr.msk.f32.mxu1 %vm655_vm1, %v654_v3 }
  0x1e   :  { %612 = vmatpush3.msra.mxu0 %v151_v19  ;;  %605 = vmatmul.mubr.f32.vlgmr.msra.gmra.mxu1 %v102_v22 }
  0x1f   :  { %613 = vmatprep.subr.mxu0 %v654_v3  ;;  %618 = vmatprep.subr.mxu1 %v654_v3 }
  0x20   :  { %614 = vmatpush3.msra.mxu0 %v158_v20  ;;  %615 = vmatprep.mubr.msk.f32.mxu0 %vm655_vm1, %v654_v3 }
  0x21   :  { %619 = vmatpush3.msra.mxu1 %v687_v4  ;;  %616 = vmatmul.mubr.f32.vlgmr.msra.gmra.mxu0 %v708_v12 }
  0x22   :  { %620 = vmatprep.subr.mxu1 %v654_v3  ;;  %626 = vmatprep.mubr.msk.f32.mxu1 %vm655_vm1, %v654_v3 }
  0x23   :  { %621 = vmatpush3.msra.mxu1 %v689_v5 }
  0x24   :  { %622 = vmatprep.subr.mxu1 %v654_v3 }
  0x25   :  { %623 = vmatpush3.msra.mxu1 %v691_v6 }
  0x26   :  { %624 = vmatprep.subr.mxu1 %v654_v3 }
  0x27   :  { %625 = vmatpush3.msra.mxu1 %v700_v9 }
  0x28   :  { %627 = vmatmul.mubr.f32.vlgmr.msra.gmra.mxu1 %v708_v12 }
  0xcf   :  { %v106_v32 = vpop.f32.mrf.mxu0 }
  0xd0   :  { %v107_v38 = vadd.f32 %v532_v35, %v106_v32 }
  0xd1   :  { %v573_v33 = vpop.f32.mrf.mxu0 }
  0xd4   :  { %v197_v34 = vpop.f32.mrf.mxu1 }
  0xd5   :  { %v198_v40 = vadd.f32 %v197_v34, %v107_v38 }
  0xd6   :  { %v584_v36 = vpop.f32.mrf.mxu1 }
  0xd8   :  { %v277_v37 = vpop.f32.mrf.mxu0 }
  0xd9   :  { %v278_v43 = vadd.f32 %v277_v37, %v198_v40 }
  0xda   :  { %v595_v39 = vpop.f32.mrf.mxu0 }
  0xde   :  { %v354_v41 = vpop.f32.mrf.mxu1 }
  0xdf   :  { %v355_v45 = vadd.f32 %v354_v41, %v278_v43 }
  0xe0   :  { %v606_v42 = vpop.f32.mrf.mxu1 }
  0xe1   :  { %v437_v44 = vpop.f32.mrf.mxu0 }
  0xe2   :  { %v438_v47 = vadd.f32 %v437_v44, %v355_v45 }
  0xe3   :  { %v617_v46 = vpop.f32.mrf.mxu0 }
  0xe8   :  { %v512_v48 = vpop.f32.mrf.mxu1 }
  0xe9   :  { %v513_v49 = vadd.f32 %v512_v48, %v438_v47 }
  0xea   :  { %v628_v50 = vpop.f32.mrf.mxu1 }
  0xeb   :  { %517 = vst.msk [vmem:[#allocation2] sm:$0xff] %vm516_vm2, %v513_v49 }
  0xec   :  { %643 = shalt.err (!%p640_p4)
}
  0xed   :  { %527 = dma.vmem_to_hbm [thread:$0]  %s525_s23, 128, %s767_s3, [#allocation3]  }
  0xee   :  { %652 = dma.done.wait [#allocation3], 128  }
  0xef   :  { %653 = vsyncadd [#allocation3], 4294967168 }
  0xf0   :  { %531 = vsyncpa [#allocation3], 1 }

</bundles_post_ra>
